<compile_context>
chip_gen: v6e
topology: v6e:2x2x1
jax: 0.10.0
libtpu: 0.0.40
codegen_flags: <defaults>
</compile_context>

<pallas_src>
import functools

import jax
import jax.numpy as jnp
from jax.experimental import pallas as pl
from jax.experimental.pallas import tpu as pltpu

LANES = 128
SUBLANES = 8
ROW_ALIGN = 16   # keeps (tr, 128) blocks legal for bf16/f16 packing too


def _device_kind():
    try:
        return jax.devices()[0].device_kind.lower()
    except Exception:
        return ""


def _num_tensorcores():
    kind = _device_kind()
    # v7x has two TensorCores per chip; v5e/v6e have one.
    return 2 if ("v7" in kind or "7x" in kind) else 1


def _default_tile_rows():
    kind = _device_kind()
    # v5e: 16 MiB scoped-VMEM default -> 4096 rows (8 MiB double-buffered).
    if "v5 lite" in kind or "v5e" in kind or "v5lite" in kind:
        return 4096
    # v6e / v7x: 32 MiB scoped default -> 8192 rows (16 MiB double-buffered).
    return 8192


def _rel_l1_kernel(pred_ref, targ_ref, out_ref, *, epsilon, kb, full_blocks,
                   tail_valid_rows, needs_gate, two_axes):
    if two_axes:
        c = pl.program_id(0)          # per-TensorCore ("parallel") axis
        k = pl.program_id(1)          # reduction ("arbitrary") axis
    else:
        c = 0
        k = pl.program_id(0)

    @pl.when(k == 0)
    def _init():
        out_ref[...] = jnp.zeros_like(out_ref)

    # Cast in-VMEM (VPU has slack under the DMA); inputs stay narrow in HBM.
    p = pred_ref[...].astype(jnp.float32)
    t = targ_ref[...].astype(jnp.float32)

    # |p - t| / (|t| + eps), divide replaced by EUP approx reciprocal plus one
    # Newton-Raphson step (rel err ~1e-7, well inside the test tolerance).
    den = jnp.abs(t) + epsilon
    r = pl.reciprocal(den, approx=True)
    r = r * (2.0 - den * r)
    rel = jnp.abs(p - t) * r

    def fold(x):
        # Vreg-shaped (8,128) partial-sum accumulation: pure VPU adds,
        # no per-step cross-lane XLU reduce.
        return x.reshape(-1, SUBLANES, LANES).sum(axis=0)

    if not needs_gate:
        # Every block is fully valid: no mask work anywhere.
        out_ref[...] += fold(rel)
    else:
        blk = c * kb + k              # logical block index

        @pl.when(blk < full_blocks)
        def _interior():              # interior blocks: unmasked accumulate
            out_ref[...] += fold(rel)

        if tail_valid_rows:
            @pl.when(blk == full_blocks)
            def _tail():              # single partial tail block: row mask only
                row = jax.lax.broadcasted_iota(jnp.int32, rel.shape, 0)
                out_ref[...] += fold(jnp.where(row < tail_valid_rows, rel, 0.0))
        # blk > full_blocks: pure over-run from per-core rounding -> skipped.


def relative_l1_loss(pred, target, epsilon=1e-8, tile_rows=None):
    """mean(|pred - target| / (|target| + epsilon)) via a Pallas TPU kernel."""
    assert pred.shape == target.shape, "pred/target shape mismatch"
    n = pred.size
    eps = float(epsilon)

    pred_f = pred.reshape(-1)
    targ_f = target.reshape(-1)

    def _plain_sum(p, t):
        p32 = p.astype(jnp.float32)
        t32 = t.astype(jnp.float32)
        return jnp.sum(jnp.abs(p32 - t32) / (jnp.abs(t32) + eps))

    n_main = (n // LANES) * LANES     # lane-aligned prefix handled by the kernel
    rows = n_main // LANES

    if rows < ROW_ALIGN:
        # Tiny input: a kernel launch is not worth it.
        return _plain_sum(pred_f, targ_f) / n

    # Lane-dense slab. Zero-copy reshape when n is 128-aligned; otherwise the
    # <128-element remainder is folded in with plain JAX below (no O(n) pad).
    if n_main == n:
        pred2d = pred_f.reshape(rows, LANES)
        targ2d = targ_f.reshape(rows, LANES)
    else:
        pred2d = pred_f[:n_main].reshape(rows, LANES)
        targ2d = targ_f[:n_main].reshape(rows, LANES)

    if tile_rows is None:
        tile_rows = _default_tile_rows()
    cores = _num_tensorcores()

    # Row tile: big (HBM-bandwidth-bound kernel), aligned to 16 rows.
    tr = min(int(tile_rows), rows)
    tr = max(ROW_ALIGN, (tr // ROW_ALIGN) * ROW_ALIGN)

    n_blocks = pl.cdiv(rows, tr)            # blocks containing valid rows
    kb = pl.cdiv(n_blocks, cores)           # reduction steps per core

    full_blocks = rows // tr                # blocks that are fully valid
    tail_valid_rows = rows - full_blocks * tr
    needs_gate = (cores * kb * tr) != rows  # tail and/or over-run blocks exist

    two_axes = cores > 1
    kernel = functools.partial(
        _rel_l1_kernel,
        epsilon=eps,
        kb=kb,
        full_blocks=full_blocks,
        tail_valid_rows=tail_valid_rows,
        needs_gate=needs_gate,
        two_axes=two_axes,
    )

    itemsize = jnp.dtype(pred.dtype).itemsize
    # 2 inputs x 2 pipeline buffers per block, plus headroom.
    vmem_limit = int(min(max(2 * 2 * tr * LANES * itemsize * 2, 16 << 20), 48 << 20))

    cost = pl.CostEstimate(
        flops=8 * n_main,
        transcendentals=n_main,
        bytes_accessed=2 * n_main * itemsize + cores * SUBLANES * LANES * 4,
    )

    if two_axes:
        def in_map(c, k):
            # Over-run steps (per-core rounding) re-read the last valid block;
            # their accumulate is skipped inside the kernel.
            return (jnp.minimum(c * kb + k, n_blocks - 1), 0)
        grid = (cores, kb)
        out_spec = pl.BlockSpec((SUBLANES, LANES), lambda c, k: (c, 0))
        out_shape = jax.ShapeDtypeStruct((cores * SUBLANES, LANES), jnp.float32)
        semantics = ("parallel", "arbitrary")
    else:
        def in_map(k):
            return (k, 0)
        grid = (kb,)
        out_spec = pl.BlockSpec((SUBLANES, LANES), lambda k: (0, 0))
        out_shape = jax.ShapeDtypeStruct((SUBLANES, LANES), jnp.float32)
        semantics = ("arbitrary",)

    partials = pl.pallas_call(
        kernel,
        out_shape=out_shape,
        grid_spec=pltpu.PrefetchScalarGridSpec(
            num_scalar_prefetch=0,
            grid=grid,
            in_specs=[
                pl.BlockSpec((tr, LANES), in_map),
                pl.BlockSpec((tr, LANES), in_map),
            ],
            # Lane-dense (8,128) partial-sum block per core; constant across
            # the reduction axis -> stays resident in VMEM (accumulator).
            out_specs=out_spec,
        ),
        compiler_params=pltpu.CompilerParams(
            dimension_semantics=semantics,
            vmem_limit_bytes=vmem_limit,
        ),
        cost_estimate=cost,
    )(pred2d, targ2d)

    total = jnp.sum(partials)
    if n_main != n:
        # Fold the <128-element unaligned remainder with plain JAX.
        total = total + _plain_sum(pred_f[n_main:], targ_f[n_main:])
    return total / n


if __name__ == "__main__":
    key = jax.random.PRNGKey(0)
    k1, k2 = jax.random.split(key)
    # Small NCHW shapes consistent with the PyTorch module's usage.
    pred = jax.random.normal(k1, (2, 4, 16, 16), dtype=jnp.float32)
    target = jax.random.normal(k2, (2, 4, 16, 16), dtype=jnp.float32)

    loss = relative_l1_loss(pred, target)
    loss = jax.block_until_ready(loss)

    # Reference check in plain JAX (same math as the PyTorch module).
    ref = jnp.mean(jnp.abs(pred - target) / (jnp.abs(target) + 1e-8))
    assert jnp.allclose(loss, ref, rtol=1e-5, atol=1e-6), (loss, ref)

    print("KERNEL_OK")
</pallas_src>

<mosaic_0001>
module attributes {stable_mosaic.version = 11 : i64} {
  func.func @_rel_l1_kernel(%arg0: i32, %arg1: memref<16x128xf32, #tpu.memory_space<vmem>>, %arg2: memref<16x128xf32, #tpu.memory_space<vmem>>, %arg3: memref<8x128xf32, #tpu.memory_space<vmem>>) attributes {dimension_semantics = [#tpu.dimension_semantics<arbitrary>], iteration_bounds = array<i64: 1>, scalar_prefetch = 0 : i64, scratch_operands = 0 : i64, tpu.core_type = #tpu.core_type<tc>, window_params = [{transform_indices = @transform_0, window_bounds = array<i64: 16, 128>}, {transform_indices = @transform_1, window_bounds = array<i64: 16, 128>}, {pipeline_mode = #tpu.pipeline_mode<synchronous>, transform_indices = @transform_2, window_bounds = array<i64: 8, 128>}]} {
    %c0_i32 = arith.constant 0 : i32
    %0 = arith.cmpi eq, %arg0, %c0_i32 : i32
    %1 = arith.extui %0 : i1 to i32
    %c0_i32_0 = arith.constant 0 : i32
    %2 = arith.cmpi ne, %1, %c0_i32_0 : i32
    scf.if %2 {
      %cst_10 = arith.constant 0.000000e+00 : f32
      %21 = vector.broadcast %cst_10 : f32 to vector<8x128xf32>
      %c0_11 = arith.constant 0 : index
      %c0_12 = arith.constant 0 : index
      %22 = vector.load %arg3[%c0_11, %c0_12] : memref<8x128xf32, #tpu.memory_space<vmem>>, vector<8x128xf32>
      tpu.vector_store %arg3[%c0_11, %c0_12], %21 {strides = array<i32>} : memref<8x128xf32, #tpu.memory_space<vmem>>, vector<8x128xf32>,
    } else {
    }
    %c0 = arith.constant 0 : index
    %c0_1 = arith.constant 0 : index
    %3 = vector.load %arg1[%c0, %c0_1] : memref<16x128xf32, #tpu.memory_space<vmem>>, vector<16x128xf32>
    %c0_2 = arith.constant 0 : index
    %c0_3 = arith.constant 0 : index
    %4 = vector.load %arg2[%c0_2, %c0_3] : memref<16x128xf32, #tpu.memory_space<vmem>>, vector<16x128xf32>
    %5 = math.absf %4 : vector<16x128xf32>
    %cst = arith.constant 9.99999993E-9 : f32
    %6 = vector.broadcast %cst : f32 to vector<16x128xf32>
    %7 = arith.addf %5, %6 : vector<16x128xf32>
    %8 = tpu.reciprocal %7 {approx = true} : vector<16x128xf32> -> vector<16x128xf32>
    %9 = arith.mulf %7, %8 : vector<16x128xf32>
    %cst_4 = arith.constant 2.000000e+00 : f32
    %10 = vector.broadcast %cst_4 : f32 to vector<16x128xf32>
    %11 = arith.subf %10, %9 : vector<16x128xf32>
    %12 = arith.mulf %8, %11 : vector<16x128xf32>
    %13 = arith.subf %3, %4 : vector<16x128xf32>
    %14 = math.absf %13 : vector<16x128xf32>
    %15 = arith.mulf %14, %12 : vector<16x128xf32>
    %c0_5 = arith.constant 0 : index
    %c0_6 = arith.constant 0 : index
    %16 = vector.load %arg3[%c0_5, %c0_6] : memref<8x128xf32, #tpu.memory_space<vmem>>, vector<8x128xf32>
    %17 = vector.shape_cast %15 : vector<16x128xf32> to vector<2x8x128xf32>
    %cst_7 = arith.constant dense<0.000000e+00> : vector<8x128xf32>
    %18 = vector.multi_reduction <add>, %17, %cst_7 [0] : vector<2x8x128xf32> to vector<8x128xf32>
    %19 = arith.addf %16, %18 : vector<8x128xf32>
    %c0_8 = arith.constant 0 : index
    %c0_9 = arith.constant 0 : index
    %20 = vector.load %arg3[%c0_8, %c0_9] : memref<8x128xf32, #tpu.memory_space<vmem>>, vector<8x128xf32>
    tpu.vector_store %arg3[%c0_8, %c0_9], %19 {strides = array<i32>} : memref<8x128xf32, #tpu.memory_space<vmem>>, vector<8x128xf32>,
    return
  }
  func.func @transform_0(%arg0: i32) -> (i32, i32) {
    %c0_i32 = arith.constant 0 : i32
    %c0_i32_0 = arith.constant 0 : i32
    return %arg0, %c0_i32 : i32, i32
  }
  func.func @transform_1(%arg0: i32) -> (i32, i32) {
    %c0_i32 = arith.constant 0 : i32
    %c0_i32_0 = arith.constant 0 : i32
    return %arg0, %c0_i32 : i32, i32
  }
  func.func @transform_2(%arg0: i32) -> (i32, i32) {
    %c0_i32 = arith.constant 0 : i32
    %c0_i32_0 = arith.constant 0 : i32
    %c0_i32_1 = arith.constant 0 : i32
    return %c0_i32, %c0_i32_0 : i32, i32
  }
}

</mosaic_0001>

<bundles_post_ra>
// kernel: tpu_custom_call.1
= control target key start
LH: loop header
LB: loop body
LE: loop exit
PB: predicated region body
PF: predicated region fallthrough
CT: control target
= control target key end

     0   :  { %7 = vsyncpa [#allocation3], 0  ;;  %s192_s0 = inlined_call_operand.hbm [shape: f32[16,128], index: 0, kind: input, shape index: {}]   ;;  %s193_s1 = inlined_call_operand.hbm [shape: f32[16,128], index: 1, kind: input, shape index: {}]   ;;  %s194_s2 = inlined_call_operand.hbm [shape: f32[8,128], index: 2, kind: output, shape index: {}]  }
   0x1   :  { %8 = vsyncpa [#allocation6], 0 }
   0x2   :  { %9 = vsyncpa [#allocation4], 0  ;;  %s163_s9 = smov [#allocation2]  }
   0x3   :  { %s15_s10 = sshll.u32 %s163_s9, 4  ;;  %s16_s10 = int_to_ptr.vmem [resolvable:$true] %s15_s10 }
   0x4   :  { %s105_s11 = scalar_lea.vmem %s16_s10, 256  ;;  %p110_p1 = scmp.lt.s32.totalorder %s16_s10, %s16_s10 }
   0x5   :  { %p106_p0 = scmp.ne.s32.totalorder %s16_s10, %s105_s11  ;;  %p111_p2 = scmp.lt.s32.totalorder %s105_s11, %s105_s11 }
   0x7   :  { %p112_p3 = por %p111_p2, %p110_p1 }
   0x9   :  { %p113_p4 = pnand %p112_p3, %p106_p0 }
   0xb   :  { %116 = shalt.err (!%p113_p4)
}
   0xc   :  { %s164_s12 = smov 128   ;;  %s165_s13 = smov 8  }
   0xd   :  { %21 = dma.hbm_to_vmem [thread:$0]  %s192_s0, 256, %s16_s10, [#allocation3], %s164_s12, %s164_s12, %s165_s13  }
   0xe   :  { %s166_s16 = smov [#allocation5]  }
   0xf   :  { %s27_s17 = sshll.u32 %s166_s16, 4  ;;  %s28_s17 = int_to_ptr.vmem [resolvable:$true] %s27_s17 }
  0x10   :  { %s125_s18 = scalar_lea.vmem %s28_s17, 256  ;;  %p130_p6 = scmp.lt.s32.totalorder %s28_s17, %s28_s17 }
  0x11   :  { %p126_p5 = scmp.ne.s32.totalorder %s28_s17, %s125_s18  ;;  %p131_p7 = scmp.lt.s32.totalorder %s125_s18, %s125_s18 }
  0x13   :  { %p132_p8 = por %p131_p7, %p130_p6 }
  0x15   :  { %p133_p9 = pnand %p132_p8, %p126_p5 }
  0x17   :  { %136 = shalt.err (!%p133_p9)
}
  0x18   :  { %33 = dma.hbm_to_vmem [thread:$0]  %s193_s1, 256, %s28_s17, [#allocation6], %s164_s12, %s164_s12, %s165_s13  }
  0x19   :  { %157 = dma.done.wait [#allocation3], 256  }
  0x1a   :  { %158 = vsyncadd [#allocation3], 4294967040 }
  0x1b   :  { %159 = dma.done.wait [#allocation6], 256  }
  0x1c   :  { %160 = vsyncadd [#allocation6], 4294967040  ;;  %v47_v0 = vld [vmem:[#allocation5] sm:$0xff]  ;;  %v48_v1 = vld [vmem:[#allocation5 + $0x8] sm:$0xff]  ;;  %s167_s0 = smov [#allocation7]  }
  0x1d   :  { %v49_v2 = vand.u32 2147483647, %v47_v0  ;;  %v50_v3 = vand.u32 2147483647, %v48_v1  ;;  %v45_v6 = vld [vmem:[#allocation2] sm:$0xff]  ;;  %v46_v7 = vld [vmem:[#allocation2 + $0x8] sm:$0xff] }
  0x1e   :  { %v61_v8 = vsub.f32 %v45_v6, %v47_v0  ;;  %v62_v10 = vsub.f32 %v46_v7, %v48_v1  ;;  %s77_s1 = sshll.u32 %s167_s0, 4  ;;  %s78_s1 = int_to_ptr.vmem [resolvable:$true] %s77_s1 }
  0x1f   :  { %v51_v4 = vadd.f32 1e-08, %v49_v2  ;;  %v52_v5 = vadd.f32 1e-08, %v50_v3  ;;  %s137_s21 = scalar_lea.vmem %s78_s1, 128  ;;  %p142_p11 = scmp.lt.s32.totalorder %s78_s1, %s78_s1 }
  0x20   :  { %v63_v15 = vand.u32 2147483647, %v61_v8  ;;  %v64_v17 = vand.u32 2147483647, %v62_v10  ;;  %p138_p10 = scmp.ne.s32.totalorder %s78_s1, %s137_s21  ;;  %p143_p12 = scmp.lt.s32.totalorder %s137_s21, %s137_s21 }
  0x21   :  { %93 = vrcp.f32 %v51_v4 }
  0x22   :  { %95 = vrcp.f32 %v52_v5  ;;  %p144_p13 = por %p143_p12, %p142_p11 }
  0x24   :  { %p145_p0 = pnand %p144_p13, %p138_p10 }
  0x2e   :  { %v94_v9 = vpop.eup %93 }
  0x2f   :  { %v96_v11 = vpop.eup %95  ;;  %v55_v12 = vmul.f32 %v94_v9, %v51_v4 }
  0x30   :  { %v56_v13 = vmul.f32 %v96_v11, %v52_v5 }
  0x31   :  { %v57_v14 = vsub.f32 2.0, %v55_v12 }
  0x32   :  { %v58_v16 = vsub.f32 2.0, %v56_v13 }
  0x33   :  { %v59_v18 = vmul.f32 %v94_v9, %v57_v14 }
  0x34   :  { %v60_v19 = vmul.f32 %v96_v11, %v58_v16 }
  0x35   :  { %v65_v20 = vmul.f32 %v63_v15, %v59_v18 }
  0x36   :  { %v66_v21 = vmul.f32 %v64_v17, %v60_v19 }
  0x38   :  { %v68_v22 = vadd.f32 %v66_v21, %v65_v20 }
  0x3a   :  { %70 = vst [vmem:[#allocation7] sm:$0xff] %v68_v22 }
  0x3b   :  { %148 = shalt.err (!%p145_p0)
}
  0x3c   :  { %80 = dma.vmem_to_hbm [thread:$0]  %s78_s1, 128, %s194_s2, [#allocation4]  }
  0x3d   :  { %161 = dma.done.wait [#allocation4], 128  }
  0x3e   :  { %162 = vsyncadd [#allocation4], 4294967168 }
  0x3f   :  { %84 = vsyncpa [#allocation3], 1 }
  0x40   :  { %85 = vsyncpa [#allocation6], 1 }
  0x41   :  { %86 = vsyncpa [#allocation4], 1 }

</bundles_post_ra>
